<compile_context>
chip_gen: v7x
topology: tpu7x:2x2x1
jax: 0.10.0
libtpu: 0.0.40
codegen_flags: <defaults>
</compile_context>

<pallas_src>
import math
import functools

import jax
import jax.numpy as jnp
from jax.experimental import pallas as pl
from jax.experimental.pallas import tpu as pltpu


def _round_up(x, m):
    return ((x + m - 1) // m) * m


def _gcn_kernel(x_ref, w_ref, b_ref, adj_ref, o_ref, support_ref):
    # x_ref:       (1, N_p, Fin_p)   same block for every row tile of a batch
    # w_ref:       (Fin_p, Fout_p)
    # b_ref:       (1, 1, Fout_p)    (zeros when the layer has no bias)
    # adj_ref:     (1, TM, N_p)      row tile of the adjacency
    # o_ref:       (1, TM, Fout_p)
    # support_ref: (N_p, Fout_p)     VMEM scratch, persists across row tiles
    @pl.when(pl.program_id(1) == 0)
    def _():
        # support = x @ W, computed once per batch element (f32 accumulation).
        s = jnp.dot(x_ref[0], w_ref[...], preferred_element_type=jnp.float32)
        support_ref[...] = s.astype(support_ref.dtype)

    # output row tile = adj_rows @ support (+ bias), f32 accumulation on MXU.
    out = jnp.dot(adj_ref[0], support_ref[...],
                  preferred_element_type=jnp.float32)
    o_ref[0] = (out + b_ref[0].astype(jnp.float32)).astype(o_ref.dtype)


def _pick_tm(n_p, fin_p, fout_p, compute_bytes, out_bytes,
             budget=40 * 1024 * 1024):
    """Largest row-tile TM in {512, 256, 128} whose working set fits budget."""
    for tm in (512, 256, 128):
        if n_p % tm:
            continue
        use = (2 * tm * n_p * compute_bytes       # double-buffered adj tile
               + n_p * fout_p * compute_bytes     # support scratch
               + 2 * tm * fout_p * out_bytes      # double-buffered out tile
               + 2 * n_p * fin_p * compute_bytes  # x block
               + fin_p * fout_p * compute_bytes)  # weight
        if use <= budget:
            return tm
    # TODO(synk): for very large N, additionally K-tile adj@support with an
    # f32 accumulator (pl.when init/finalize) so VMEM is bounded independent of N.
    return 128


@functools.partial(jax.jit, static_argnames=("compute_dtype",))
def graph_convolution(x, adj, weight, bias=None, *,
                      compute_dtype=jnp.float32):
    """Pallas GCN layer forward.

    x:      (B, N, Fin)
    adj:    (B, N, N)
    weight: (Fin, Fout)
    bias:   (1, 1, Fout) or None
    returns (B, N, Fout) in x.dtype
    """
    B, N, Fin = x.shape
    Fout = weight.shape[1]
    out_dtype = x.dtype

    # Pad to lane/MXU friendly sizes (multiples of 128); sliced back at the end.
    fin_p = _round_up(Fin, 128)
    fout_p = _round_up(Fout, 128)
    n_p = _round_up(N, 128)

    cbytes = jnp.dtype(compute_dtype).itemsize
    obytes = jnp.dtype(out_dtype).itemsize
    tm = _pick_tm(n_p, fin_p, fout_p, cbytes, obytes)

    x_p = jnp.zeros((B, n_p, fin_p), compute_dtype).at[:, :N, :Fin].set(
        x.astype(compute_dtype))
    adj_p = jnp.zeros((B, n_p, n_p), compute_dtype).at[:, :N, :N].set(
        adj.astype(compute_dtype))
    w_p = jnp.zeros((fin_p, fout_p), compute_dtype).at[:Fin, :Fout].set(
        weight.astype(compute_dtype))
    if bias is None:
        b_p = jnp.zeros((1, 1, fout_p), jnp.float32)
    else:
        b_p = jnp.zeros((1, 1, fout_p), jnp.float32).at[:, :, :Fout].set(
            bias.astype(jnp.float32))

    grid = (B, n_p // tm)
    out_shape = jax.ShapeDtypeStruct((B, n_p, fout_p), out_dtype)

    x_spec = pl.BlockSpec((1, n_p, fin_p), lambda b, i: (b, 0, 0))
    w_spec = pl.BlockSpec((fin_p, fout_p), lambda b, i: (0, 0))
    b_spec = pl.BlockSpec((1, 1, fout_p), lambda b, i: (0, 0, 0))
    adj_spec = pl.BlockSpec((1, tm, n_p), lambda b, i: (b, i, 0))
    out_spec = pl.BlockSpec((1, tm, fout_p), lambda b, i: (b, i, 0))

    out = pl.pallas_call(
        _gcn_kernel,
        out_shape=out_shape,
        grid_spec=pltpu.PrefetchScalarGridSpec(
            num_scalar_prefetch=0,
            grid=grid,
            in_specs=[x_spec, w_spec, b_spec, adj_spec],
            out_specs=out_spec,
            scratch_shapes=[pltpu.VMEM((n_p, fout_p), compute_dtype)],
        ),
        compiler_params=pltpu.CompilerParams(
            dimension_semantics=("parallel", "arbitrary"),
            vmem_limit_bytes=48 * 1024 * 1024),
    )(x_p, w_p, b_p, adj_p)

    return out[:, :N, :Fout]


def init_gcn_params(key, in_features, out_features, bias=False):
    """Deterministic init matching reset_parameters(): U(-stdv, stdv),
    stdv = 1/sqrt(out_features)."""
    stdv = 1.0 / math.sqrt(out_features)
    kw, kb = jax.random.split(key)
    weight = jax.random.uniform(
        kw, (in_features, out_features), jnp.float32, minval=-stdv, maxval=stdv)
    if bias:
        b = jax.random.uniform(
            kb, (1, 1, out_features), jnp.float32, minval=-stdv, maxval=stdv)
    else:
        b = None
    return weight, b


if __name__ == "__main__":
    key = jax.random.PRNGKey(0)
    k_x, k_adj, k_p1, k_p2 = jax.random.split(key, 4)

    # Small shapes consistent with the module: batch of graphs, N nodes,
    # in_features -> out_features.
    B, N, Fin, Fout = 2, 8, 16, 32

    x = jax.random.normal(k_x, (B, N, Fin), jnp.float32)
    adj_raw = jax.random.uniform(k_adj, (B, N, N), jnp.float32)
    # simple symmetric row-normalized adjacency (forward semantics don't
    # depend on it; just a plausible adj input)
    adj = adj_raw + jnp.transpose(adj_raw, (0, 2, 1))
    adj = adj / jnp.sum(adj, axis=-1, keepdims=True)

    # --- no-bias variant (module default), f32 compute: exact path ---
    w0, _ = init_gcn_params(k_p1, Fin, Fout, bias=False)
    out0 = graph_convolution(x, adj, w0)
    jax.block_until_ready(out0)
    ref0 = jnp.einsum("bij,bjf->bif", adj, jnp.einsum("bni,io->bno", x, w0))
    assert out0.shape == (B, N, Fout)
    assert jnp.allclose(out0, ref0, atol=1e-4, rtol=1e-4)

    # --- bias variant, f32 compute ---
    w1, b1 = init_gcn_params(k_p2, Fin, Fout, bias=True)
    out1 = graph_convolution(x, adj, w1, b1)
    jax.block_until_ready(out1)
    ref1 = jnp.einsum("bij,bjf->bif", adj, jnp.einsum("bni,io->bno", x, w1)) + b1
    assert out1.shape == (B, N, Fout)
    assert jnp.allclose(out1, ref1, atol=1e-4, rtol=1e-4)

    # --- bias variant, bf16 MXU inputs with f32 accumulation (fast path) ---
    out2 = graph_convolution(x, adj, w1, b1, compute_dtype=jnp.bfloat16)
    jax.block_until_ready(out2)
    assert out2.shape == (B, N, Fout)
    assert jnp.allclose(out2.astype(jnp.float32), ref1, atol=3e-2, rtol=3e-2)

    print("KERNEL_OK")
</pallas_src>

<mosaic_0001>
module attributes {stable_mosaic.version = 11 : i64} {
  func.func @_gcn_kernel(%arg0: i32, %arg1: i32, %arg2: memref<1x128x128xf32, #tpu.memory_space<vmem>>, %arg3: memref<128x128xf32, #tpu.memory_space<vmem>>, %arg4: memref<1x1x128xf32, #tpu.memory_space<vmem>>, %arg5: memref<1x128x128xf32, #tpu.memory_space<vmem>>, %arg6: memref<1x128x128xf32, #tpu.memory_space<vmem>>, %arg7: memref<128x128xf32, #tpu.memory_space<vmem>>) attributes {dimension_semantics = [#tpu.dimension_semantics<parallel>, #tpu.dimension_semantics<arbitrary>], iteration_bounds = array<i64: 2, 1>, scalar_prefetch = 0 : i64, scratch_operands = 1 : i64, tpu.core_type = #tpu.core_type<tc>, window_params = [{transform_indices = @transform_0, window_bounds = array<i64: 1, 128, 128>}, {pipeline_mode = #tpu.pipeline_mode<synchronous>, transform_indices = @transform_1, window_bounds = array<i64: 128, 128>}, {pipeline_mode = #tpu.pipeline_mode<synchronous>, transform_indices = @transform_2, window_bounds = array<i64: 1, 1, 128>}, {transform_indices = @transform_3, window_bounds = array<i64: 1, 128, 128>}, {transform_indices = @transform_4, window_bounds = array<i64: 1, 128, 128>}]} {
    %c0_i32 = arith.constant 0 : i32
    %0 = arith.cmpi eq, %arg1, %c0_i32 : i32
    %1 = arith.extui %0 : i1 to i32
    %c0_i32_0 = arith.constant 0 : i32
    %2 = arith.cmpi ne, %1, %c0_i32_0 : i32
    scf.if %2 {
      %c0_11 = arith.constant 0 : index
      %c0_12 = arith.constant 0 : index
      %c0_13 = arith.constant 0 : index
      %14 = vector.load %arg2[%c0_11, %c0_12, %c0_13] : memref<1x128x128xf32, #tpu.memory_space<vmem>>, vector<1x128x128xf32>
      %15 = vector.shape_cast %14 : vector<1x128x128xf32> to vector<128x128xf32>
      %c0_14 = arith.constant 0 : index
      %c0_15 = arith.constant 0 : index
      %16 = vector.load %arg3[%c0_14, %c0_15] : memref<128x128xf32, #tpu.memory_space<vmem>>, vector<128x128xf32>
      %cst_16 = arith.constant dense<0.000000e+00> : vector<128x128xf32>
      %17 = tpu.matmul %15, %16, %cst_16 {dimension_numbers = #tpu.dot_dimension_numbers<[1], [0], [0], [1], [0, 0, 1, 1], [], []>} : vector<128x128xf32>, vector<128x128xf32>, vector<128x128xf32> -> vector<128x128xf32>
      %c0_17 = arith.constant 0 : index
      %c0_18 = arith.constant 0 : index
      %18 = vector.load %arg7[%c0_17, %c0_18] : memref<128x128xf32, #tpu.memory_space<vmem>>, vector<128x128xf32>
      tpu.vector_store %arg7[%c0_17, %c0_18], %17 {strides = array<i32>} : memref<128x128xf32, #tpu.memory_space<vmem>>, vector<128x128xf32>,
    } else {
    }
    %c0 = arith.constant 0 : index
    %c0_1 = arith.constant 0 : index
    %c0_2 = arith.constant 0 : index
    %3 = vector.load %arg5[%c0, %c0_1, %c0_2] : memref<1x128x128xf32, #tpu.memory_space<vmem>>, vector<1x128x128xf32>
    %4 = vector.shape_cast %3 : vector<1x128x128xf32> to vector<128x128xf32>
    %c0_3 = arith.constant 0 : index
    %c0_4 = arith.constant 0 : index
    %5 = vector.load %arg7[%c0_3, %c0_4] : memref<128x128xf32, #tpu.memory_space<vmem>>, vector<128x128xf32>
    %cst = arith.constant dense<0.000000e+00> : vector<128x128xf32>
    %6 = tpu.matmul %4, %5, %cst {dimension_numbers = #tpu.dot_dimension_numbers<[1], [0], [0], [1], [0, 0, 1, 1], [], []>} : vector<128x128xf32>, vector<128x128xf32>, vector<128x128xf32> -> vector<128x128xf32>
    %c0_5 = arith.constant 0 : index
    %c0_6 = arith.constant 0 : index
    %c0_7 = arith.constant 0 : index
    %7 = vector.load %arg4[%c0_5, %c0_6, %c0_7] : memref<1x1x128xf32, #tpu.memory_space<vmem>>, vector<1x1x128xf32>
    %8 = vector.shape_cast %7 : vector<1x1x128xf32> to vector<1x128xf32>
    %9 = vector.broadcast %8 : vector<1x128xf32> to vector<128x128xf32>
    %10 = arith.addf %6, %9 : vector<128x128xf32>
    %c0_8 = arith.constant 0 : index
    %c0_9 = arith.constant 0 : index
    %c0_10 = arith.constant 0 : index
    %11 = vector.load %arg6[%c0_8, %c0_9, %c0_10] : memref<1x128x128xf32, #tpu.memory_space<vmem>>, vector<1x128x128xf32>
    %12 = vector.shape_cast %11 : vector<1x128x128xf32> to vector<128x128xf32>
    %13 = vector.shape_cast %10 : vector<128x128xf32> to vector<1x128x128xf32>
    tpu.vector_store %arg6[%c0_8, %c0_9, %c0_10], %13 {strides = array<i32>} : memref<1x128x128xf32, #tpu.memory_space<vmem>>, vector<1x128x128xf32>,
    return
  }
  func.func @transform_0(%arg0: i32, %arg1: i32) -> (i32, i32, i32) {
    %c0_i32 = arith.constant 0 : i32
    %c0_i32_0 = arith.constant 0 : i32
    %c0_i32_1 = arith.constant 0 : i32
    return %arg0, %c0_i32, %c0_i32_0 : i32, i32, i32
  }
  func.func @transform_1(%arg0: i32, %arg1: i32) -> (i32, i32) {
    %c0_i32 = arith.constant 0 : i32
    %c0_i32_0 = arith.constant 0 : i32
    %c0_i32_1 = arith.constant 0 : i32
    return %c0_i32, %c0_i32_0 : i32, i32
  }
  func.func @transform_2(%arg0: i32, %arg1: i32) -> (i32, i32, i32) {
    %c0_i32 = arith.constant 0 : i32
    %c0_i32_0 = arith.constant 0 : i32
    %c0_i32_1 = arith.constant 0 : i32
    %c0_i32_2 = arith.constant 0 : i32
    return %c0_i32, %c0_i32_0, %c0_i32_1 : i32, i32, i32
  }
  func.func @transform_3(%arg0: i32, %arg1: i32) -> (i32, i32, i32) {
    %c0_i32 = arith.constant 0 : i32
    %c0_i32_0 = arith.constant 0 : i32
    return %arg0, %arg1, %c0_i32 : i32, i32, i32
  }
  func.func @transform_4(%arg0: i32, %arg1: i32) -> (i32, i32, i32) {
    %c0_i32 = arith.constant 0 : i32
    %c0_i32_0 = arith.constant 0 : i32
    return %arg0, %arg1, %c0_i32 : i32, i32, i32
  }
}

</mosaic_0001>

<bundles_post_ra>
// kernel: graph_convolution.1
= control target key start
LH: loop header
LB: loop body
LE: loop exit
PB: predicated region body
PF: predicated region fallthrough
CT: control target
= control target key end

     0   :  { %s1083_s15 = smov 0   ;;  %s1085_s16 = smov 0   ;;  %s1229_s0 = inlined_call_operand.vmem [shape: f32[2,128,128], index: 0, kind: input, shape index: {}]   ;;  %s1230_s1 = inlined_call_operand.vmem [shape: f32[128,128], index: 1, kind: input, shape index: {}]   ;;  %s1231_s2 = inlined_call_operand.vmem [shape: f32[1,1,128], index: 2, kind: input, shape index: {}]   ;;  %s1232_s3 = inlined_call_operand.vmem [shape: f32[2,128,128], index: 3, kind: input, shape index: {}]   ;;  %s1233_s4 = inlined_call_operand.vmem [shape: f32[2,128,128], index: 4, kind: output, shape index: {}]  }
   0x1   :  { %s1087_s17 = smov 0  }
   0x2 LB: > { %s26_s18 = sadd.s32 1, %s1052_s16  ;;  %p757_p0 = scmp.ge.s32.totalorder %s1056_s17, 1  ;;  %s1056_s17 = sphi %s1087_s17, %s14_s17   ;;  %s1052_s16 = sphi %s1085_s16, %s1235_s16   ;;  %s1048_s15 = sphi %s1083_s15, %s1234_s15  }
   0x3   : > { %p28_p1 = scmp.ge.s32.totalorder %s26_s18, 2  ;;  %p193_p2 = scmp.lt.s32.totalorder %s1056_s17, 3 }
   0x5   : > { %s1237_s18 = smov (%p28_p1, %s26_s18), 0  ;;  %p194_p3 = pnand %p757_p0, %p193_p2 }
   0x6   : > { %v277_v0 = vld [vmem:[%s1230_s1] sm:$0xff] (!%p194_p3)  ;;  %v278_v1 = vld [vmem:[%s1230_s1 + $0x8] sm:$0xff] (!%p194_p3)  ;;  %v279_v2 = vld [vmem:[%s1230_s1 + $0x10] sm:$0xff] (!%p194_p3)  ;;  %p232_p4 = scmp.lt.s32.totalorder (!%p194_p3), %s1048_s15, 1 }
   0x7   : > { %197 = sbr.rel (%p194_p3) target bundleno = 532 (0x214), region = 36  ;;  %v946_v3 = vpack.c.bf16 (!%p194_p3), %v278_v1, %v277_v0  ;;  %v280_v4 = vld [vmem:[%s1230_s1 + $0x18] sm:$0xff] (!%p194_p3)  ;;  %v281_v6 = vld [vmem:[%s1230_s1 + $0x20] sm:$0xff] (!%p194_p3)  ;;  %v282_v7 = vld [vmem:[%s1230_s1 + $0x28] sm:$0xff] (!%p194_p3) }
   0x8   : > { %v950_v5 = vpack.c.bf16 (!%p194_p3), %v280_v4, %v279_v2  ;;  %v954_v8 = vpack.c.bf16 (!%p194_p3), %v282_v7, %v281_v6  ;;  %v283_v9 = vld [vmem:[%s1230_s1 + $0x30] sm:$0xff] (!%p194_p3)  ;;  %v284_v10 = vld [vmem:[%s1230_s1 + $0x38] sm:$0xff] (!%p194_p3)  ;;  %v285_v13 = vld [vmem:[%s1230_s1 + $0x40] sm:$0xff] (!%p194_p3) }
   0x9   : > { %947 = vmatprep.subr.bf16.mxu0 (!%p194_p3), %v946_v3  ;;  %v958_v12 = vpack.c.bf16 (!%p194_p3), %v284_v10, %v283_v9  ;;  %v286_v14 = vld [vmem:[%s1230_s1 + $0x48] sm:$0xff] (!%p194_p3)  ;;  %v287_v16 = vld [vmem:[%s1230_s1 + $0x50] sm:$0xff] (!%p194_p3)  ;;  %v288_v17 = vld [vmem:[%s1230_s1 + $0x58] sm:$0xff] (!%p194_p3) }
   0xa   : > { %949 = vmatpush3.bf16.msra.mxu0 (!%p194_p3), %v946_v3  ;;  %v962_v15 = vpack.c.bf16 (!%p194_p3), %v286_v14, %v285_v13  ;;  %v966_v18 = vpack.c.bf16 (!%p194_p3), %v288_v17, %v287_v16  ;;  %v289_v19 = vld [vmem:[%s1230_s1 + $0x60] sm:$0xff] (!%p194_p3)  ;;  %v290_v20 = vld [vmem:[%s1230_s1 + $0x68] sm:$0xff] (!%p194_p3)  ;;  %v291_v22 = vld [vmem:[%s1230_s1 + $0x70] sm:$0xff] (!%p194_p3) }
   0xb   : > { %951 = vmatprep.subr.bf16.mxu0 (!%p194_p3), %v950_v5  ;;  %v970_v21 = vpack.c.bf16 (!%p194_p3), %v290_v20, %v289_v19  ;;  %v292_v23 = vld [vmem:[%s1230_s1 + $0x78] sm:$0xff] (!%p194_p3)  ;;  %v764_v16 = vld [vmem:[%s1231_s2] ss:$0 sm:$0xff] (!%p194_p3) }
   0xc   : > { %v974_v24 = vpack.c.bf16 (!%p194_p3), %v292_v23, %v291_v22 }
   0xe   : > { %s1239_s15 = smov (!%p232_p4, %s1048_s15), 1  ;;  %953 = vmatpush3.bf16.msra.mxu0 %v950_v5 }
   0xf   : > { %s1119_s5 = sshll.u32 %s1239_s15, 7  ;;  %955 = vmatprep.subr.bf16.mxu0 %v954_v8 }
  0x10   : > { %s1125_s8 = scalar_lea.vmem %s1229_s0, %s1119_s5  ;;  %s1177_s10 = scalar_lea.vmem %s1232_s3, %s1119_s5 }
  0x11   : > { %v261_v11 = vld [vmem:[%s1125_s8] sm:$0xff]  ;;  %v262_v25 = vld [vmem:[%s1125_s8 + $0x8] sm:$0xff]  ;;  %v263_v26 = vld [vmem:[%s1125_s8 + $0x10] sm:$0xff]  ;;  %s1202_s14 = scalar_lea.vmem %s1233_s4, %s1119_s5 }
  0x12   : > { %866 = vmatprep.mubr.f32.mxu0 %v261_v11  ;;  %957 = vmatpush3.bf16.msra.mxu0 %v954_v8  ;;  %v264_v27 = vld [vmem:[%s1125_s8 + $0x18] sm:$0xff]  ;;  %v265_v28 = vld [vmem:[%s1125_s8 + $0x20] sm:$0xff]  ;;  %v266_v29 = vld [vmem:[%s1125_s8 + $0x28] sm:$0xff] }
  0x13   : > { %959 = vmatprep.subr.bf16.mxu0 %v958_v12  ;;  %v267_v30 = vld [vmem:[%s1125_s8 + $0x30] sm:$0xff]  ;;  %v268_v31 = vld [vmem:[%s1125_s8 + $0x38] sm:$0xff]  ;;  %v269_v32 = vld [vmem:[%s1125_s8 + $0x40] sm:$0xff] }
  0x14   : > { %v270_v33 = vld [vmem:[%s1125_s8 + $0x48] sm:$0xff]  ;;  %v271_v34 = vld [vmem:[%s1125_s8 + $0x50] sm:$0xff]  ;;  %v272_v35 = vld [vmem:[%s1125_s8 + $0x58] sm:$0xff] }
  0x15   : > { %v273_v36 = vld [vmem:[%s1125_s8 + $0x60] sm:$0xff]  ;;  %v274_v37 = vld [vmem:[%s1125_s8 + $0x68] sm:$0xff]  ;;  %v275_v38 = vld [vmem:[%s1125_s8 + $0x70] sm:$0xff] }
  0x16   : > { %961 = vmatpush3.bf16.msra.mxu0 %v958_v12  ;;  %v276_v39 = vld [vmem:[%s1125_s8 + $0x78] sm:$0xff]  ;;  %v454_v40 = vld [vmem:[%s1177_s10] sm:$0xff]  ;;  %v455_v1 = vld [vmem:[%s1177_s10 + $0x8] sm:$0xff] }
  0x17   : > { %963 = vmatprep.subr.bf16.mxu0 %v962_v15  ;;  %922 = vmatprep.mubr.f32.mxu1 %v454_v40  ;;  %v456_v2 = vld [vmem:[%s1177_s10 + $0x10] sm:$0xff]  ;;  %v457_v3 = vld [vmem:[%s1177_s10 + $0x18] sm:$0xff]  ;;  %v458_v4 = vld [vmem:[%s1177_s10 + $0x20] sm:$0xff] }
  0x18   : > { %v459_v5 = vld [vmem:[%s1177_s10 + $0x28] sm:$0xff]  ;;  %v460_v6 = vld [vmem:[%s1177_s10 + $0x30] sm:$0xff]  ;;  %v461_v7 = vld [vmem:[%s1177_s10 + $0x38] sm:$0xff] }
  0x19   : > { %v462_v8 = vld [vmem:[%s1177_s10 + $0x40] sm:$0xff]  ;;  %v463_v9 = vld [vmem:[%s1177_s10 + $0x48] sm:$0xff]  ;;  %v464_v10 = vld [vmem:[%s1177_s10 + $0x50] sm:$0xff] }
  0x1a   : > { %965 = vmatpush3.bf16.msra.mxu0 %v962_v15  ;;  %v465_v11 = vld [vmem:[%s1177_s10 + $0x58] sm:$0xff]  ;;  %v466_v12 = vld [vmem:[%s1177_s10 + $0x60] sm:$0xff]  ;;  %v467_v13 = vld [vmem:[%s1177_s10 + $0x68] sm:$0xff] }
  0x1b   : > { %967 = vmatprep.subr.bf16.mxu0 %v966_v18  ;;  %v468_v14 = vld [vmem:[%s1177_s10 + $0x70] sm:$0xff]  ;;  %v469_v15 = vld [vmem:[%s1177_s10 + $0x78] sm:$0xff] }
  0x1e   : > { %969 = vmatpush3.bf16.msra.mxu0 %v966_v18 }
  0x1f   : > { %971 = vmatprep.subr.bf16.mxu0 %v970_v21 }
  0x22   : > { %973 = vmatpush3.bf16.msra.mxu0 %v970_v21 }
  0x23   : > { %975 = vmatprep.subr.bf16.mxu0 %v974_v24 }
  0x26   : > { %977 = vmatpush3.bf16.msra.mxu0 %v974_v24 }
  0x29   : > { %867 = vmatmul.mubr.f32.vlgmr.msra.gmra.mrb[0].mxu0 %v262_v25 }
  0x2a   : > { %869 = vmatprep.mubr.f32.mxu0 %v263_v26 }
  0x2d   : > { %870 = vmatmul.mubr.f32.gmra.mrb[2].mxu0 %v264_v27 }
  0x2e   : > { %872 = vmatprep.mubr.f32.mxu0 %v265_v28 }
  0x31   : > { %873 = vmatmul.mubr.f32.gmra.mrb[4].mxu0 %v266_v29 }
  0x32   : > { %875 = vmatprep.mubr.f32.mxu0 %v267_v30 }
  0x35   : > { %876 = vmatmul.mubr.f32.gmra.mrb[6].mxu0 %v268_v31 }
  0x36   : > { %878 = vmatprep.mubr.f32.mxu0 %v269_v32 }
  0x39   : > { %879 = vmatmul.mubr.f32.gmra.mrb[8].mxu0 %v270_v33 }
  0x3a   : > { %881 = vmatprep.mubr.f32.mxu0 %v271_v34 }
  0x3d   : > { %882 = vmatmul.mubr.f32.gmra.mrb[10].mxu0 %v272_v35 }
  0x3e   : > { %884 = vmatprep.mubr.f32.mxu0 %v273_v36 }
  0x41   : > { %885 = vmatmul.mubr.f32.gmra.mrb[12].mxu0 %v274_v37 }
  0x42   : > { %887 = vmatprep.mubr.f32.mxu0 %v275_v38 }
  0x45   : > { %888 = vmatmul.mubr.f32.gmra.mrb[14].mxu0 %v276_v39 }
  0xfc   : > { %v868_v41 = vpop.f32.mrb[0].mxu0 }
  0xfd   : > { %v359_v42 = vpop.f32.mrb[1].mxu0 }
  0xfe   : > { %v978_v43 = vpack.c.bf16 %v868_v41, %v359_v42 }
 0x100   : > { %v871_v44 = vpop.f32.mrb[2].mxu0  ;;  %979 = vmatprep.subr.bf16.mxu1 %v978_v43 }
 0x101   : > { %v369_v45 = vpop.f32.mrb[3].mxu0  ;;  %981 = vmatpush3.bf16.msra.mxu1 %v978_v43 }
 0x102   : > { %v982_v46 = vpack.c.bf16 %v871_v44, %v369_v45 }
 0x104   : > { %v874_v47 = vpop.f32.mrb[4].mxu0  ;;  %983 = vmatprep.subr.bf16.mxu1 %v982_v46 }
 0x105   : > { %v379_v48 = vpop.f32.mrb[5].mxu0  ;;  %985 = vmatpush3.bf16.msra.mxu1 %v982_v46 }
 0x106   : > { %v986_v49 = vpack.c.bf16 %v874_v47, %v379_v48 }
 0x108   : > { %v877_v50 = vpop.f32.mrb[6].mxu0  ;;  %987 = vmatprep.subr.bf16.mxu1 %v986_v49 }
 0x109   : > { %v389_v51 = vpop.f32.mrb[7].mxu0  ;;  %989 = vmatpush3.bf16.msra.mxu1 %v986_v49 }
 0x10a   : > { %v990_v52 = vpack.c.bf16 %v877_v50, %v389_v51 }
 0x10c   : > { %v880_v53 = vpop.f32.mrb[8].mxu0  ;;  %991 = vmatprep.subr.bf16.mxu1 %v990_v52 }
 0x10d   : > { %v399_v54 = vpop.f32.mrb[9].mxu0  ;;  %993 = vmatpush3.bf16.msra.mxu1 %v990_v52 }
 0x10e   : > { %v994_v55 = vpack.c.bf16 %v880_v53, %v399_v54 }
 0x110   : > { %v883_v56 = vpop.f32.mrb[10].mxu0  ;;  %995 = vmatprep.subr.bf16.mxu1 %v994_v55 }
 0x111   : > { %v409_v57 = vpop.f32.mrb[11].mxu0  ;;  %997 = vmatpush3.bf16.msra.mxu1 %v994_v55 }
 0x112   : > { %v998_v58 = vpack.c.bf16 %v883_v56, %v409_v57 }
 0x114   : > { %v886_v59 = vpop.f32.mrb[12].mxu0  ;;  %999 = vmatprep.subr.bf16.mxu1 %v998_v58 }
 0x115   : > { %v419_v60 = vpop.f32.mrb[13].mxu0  ;;  %1001 = vmatpush3.bf16.msra.mxu1 %v998_v58 }
 0x116   : > { %v1002_v61 = vpack.c.bf16 %v886_v59, %v419_v60 }
 0x118   : > { %v889_v62 = vpop.f32.mrb[14].mxu0  ;;  %1003 = vmatprep.subr.bf16.mxu1 %v1002_v61 }
 0x119   : > { %v429_v63 = vpop.f32.mrb[15].mxu0  ;;  %1005 = vmatpush3.bf16.msra.mxu1 %v1002_v61 }
 0x11a   : > { %v1006_v0 = vpack.c.bf16 %v889_v62, %v429_v63 }
 0x11c   : > { %1007 = vmatprep.subr.bf16.mxu1 %v1006_v0 }
 0x11d   : > { %1009 = vmatpush3.bf16.msra.mxu1 %v1006_v0 }
 0x120   : > { %923 = vmatmul.mubr.f32.vlgmr.msra.gmra.mrb[0].mxu1 %v455_v1 }
 0x121   : > { %925 = vmatprep.mubr.f32.mxu1 %v456_v2 }
 0x124   : > { %926 = vmatmul.mubr.f32.gmra.mrb[2].mxu1 %v457_v3 }
 0x125   : > { %928 = vmatprep.mubr.f32.mxu1 %v458_v4 }
 0x128   : > { %929 = vmatmul.mubr.f32.gmra.mrb[4].mxu1 %v459_v5 }
 0x129   : > { %931 = vmatprep.mubr.f32.mxu1 %v460_v6 }
 0x12c   : > { %932 = vmatmul.mubr.f32.gmra.mrb[6].mxu1 %v461_v7 }
 0x12d   : > { %934 = vmatprep.mubr.f32.mxu1 %v462_v8 }
 0x130   : > { %935 = vmatmul.mubr.f32.gmra.mrb[8].mxu1 %v463_v9 }
 0x131   : > { %937 = vmatprep.mubr.f32.mxu1 %v464_v10 }
 0x134   : > { %938 = vmatmul.mubr.f32.gmra.mrb[10].mxu1 %v465_v11 }
 0x135   : > { %940 = vmatprep.mubr.f32.mxu1 %v466_v12 }
 0x138   : > { %941 = vmatmul.mubr.f32.gmra.mrb[12].mxu1 %v467_v13 }
 0x139   : > { %943 = vmatprep.mubr.f32.mxu1 %v468_v14 }
 0x13c   : > { %944 = vmatmul.mubr.f32.gmra.mrb[14].mxu1 %v469_v15 }
 0x1f3   : > { %v924_v17 = vpop.f32.mrb[0].mxu1 }
 0x1f4   : > { %v565_v18 = vadd.f32 %v924_v17, %v764_v16  ;;  %v559_v19 = vpop.f32.mrb[1].mxu1 }
 0x1f5   : > { %v560_v20 = vadd.f32 %v764_v16, %v559_v19 }
 0x1f6   : > { %639 = vst [vmem:[%s1202_s14 + $0x8] sm:$0xff] %v565_v18 }
 0x1f7   : > { %638 = vst [vmem:[%s1202_s14] sm:$0xff] %v560_v20  ;;  %v927_v21 = vpop.f32.mrb[2].mxu1 }
 0x1f8   : > { %v575_v22 = vadd.f32 %v927_v21, %v764_v16  ;;  %v569_v23 = vpop.f32.mrb[3].mxu1 }
 0x1f9   : > { %v570_v24 = vadd.f32 %v764_v16, %v569_v23 }
 0x1fa   : > { %641 = vst [vmem:[%s1202_s14 + $0x18] sm:$0xff] %v575_v22 }
 0x1fb   : > { %640 = vst [vmem:[%s1202_s14 + $0x10] sm:$0xff] %v570_v24  ;;  %v930_v25 = vpop.f32.mrb[4].mxu1 }
 0x1fc   : > { %v585_v26 = vadd.f32 %v930_v25, %v764_v16  ;;  %v579_v27 = vpop.f32.mrb[5].mxu1 }
 0x1fd   : > { %v580_v28 = vadd.f32 %v764_v16, %v579_v27 }
 0x1fe   : > { %643 = vst [vmem:[%s1202_s14 + $0x28] sm:$0xff] %v585_v26 }
 0x1ff   : > { %642 = vst [vmem:[%s1202_s14 + $0x20] sm:$0xff] %v580_v28  ;;  %v933_v29 = vpop.f32.mrb[6].mxu1 }
 0x200   : > { %v595_v30 = vadd.f32 %v933_v29, %v764_v16  ;;  %v589_v31 = vpop.f32.mrb[7].mxu1 }
 0x201   : > { %v590_v32 = vadd.f32 %v764_v16, %v589_v31 }
 0x202   : > { %645 = vst [vmem:[%s1202_s14 + $0x38] sm:$0xff] %v595_v30 }
 0x203   : > { %644 = vst [vmem:[%s1202_s14 + $0x30] sm:$0xff] %v590_v32  ;;  %v936_v33 = vpop.f32.mrb[8].mxu1 }
 0x204   : > { %v605_v34 = vadd.f32 %v936_v33, %v764_v16  ;;  %v599_v35 = vpop.f32.mrb[9].mxu1 }
 0x205   : > { %v600_v36 = vadd.f32 %v764_v16, %v599_v35 }
 0x206   : > { %647 = vst [vmem:[%s1202_s14 + $0x48] sm:$0xff] %v605_v34 }
 0x207   : > { %646 = vst [vmem:[%s1202_s14 + $0x40] sm:$0xff] %v600_v36  ;;  %v939_v37 = vpop.f32.mrb[10].mxu1 }
 0x208   : > { %v615_v38 = vadd.f32 %v939_v37, %v764_v16  ;;  %v609_v39 = vpop.f32.mrb[11].mxu1 }
 0x209   : > { %v610_v40 = vadd.f32 %v764_v16, %v609_v39 }
 0x20a   : > { %649 = vst [vmem:[%s1202_s14 + $0x58] sm:$0xff] %v615_v38 }
 0x20b   : > { %648 = vst [vmem:[%s1202_s14 + $0x50] sm:$0xff] %v610_v40  ;;  %v942_v41 = vpop.f32.mrb[12].mxu1 }
 0x20c   : > { %v625_v42 = vadd.f32 %v942_v41, %v764_v16  ;;  %v619_v43 = vpop.f32.mrb[13].mxu1 }
 0x20d   : > { %v620_v44 = vadd.f32 %v764_v16, %v619_v43 }
 0x20e   : > { %651 = vst [vmem:[%s1202_s14 + $0x68] sm:$0xff] %v625_v42 }
 0x20f   : > { %650 = vst [vmem:[%s1202_s14 + $0x60] sm:$0xff] %v620_v44  ;;  %v945_v45 = vpop.f32.mrb[14].mxu1 }
 0x210   : > { %v635_v46 = vadd.f32 %v945_v45, %v764_v16  ;;  %v629_v47 = vpop.f32.mrb[15].mxu1 }
 0x211   : > { %v630_v48 = vadd.f32 %v764_v16, %v629_v47 }
 0x212   : > { %653 = vst [vmem:[%s1202_s14 + $0x78] sm:$0xff] %v635_v46 }
 0x213   : > { %652 = vst [vmem:[%s1202_s14 + $0x70] sm:$0xff] %v630_v48 }
 0x214 PF: > { %s14_s17 = sadd.s32 1, %s1056_s17   ;;  %s1234_s15 = smov %s1052_s16 }
 0x215   : > { %p11_p5 = scmp.ge.s32.totalorder %s14_s17, 4   ;;  %s1235_s16 = smov %s1237_s18 }
 0x217   :  { %13 = sbr.rel (!%p11_p5) target bundleno = 2 (0x2), region = 73 }

</bundles_post_ra>
